<compile_context>
chip_gen: v6e
topology: v6e:2x2x1
jax: 0.10.0
libtpu: 0.0.40
codegen_flags: <defaults>
</compile_context>

<pallas_src>
import math
from functools import partial

import jax
import jax.numpy as jnp
import numpy as np
from jax.experimental import pallas as pl
from jax.experimental.pallas import tpu as pltpu


# Conservative per-step VMEM budget: leaves headroom inside v7x's 64 MiB while being
# far below v5e/v6e's 128 MiB.
_VMEM_BUDGET_BYTES = 40 * 1024 * 1024


def _sdpa_kernel(*refs, inv_scale, has_mask):
    """Fused QK^T -> scale -> mask -> softmax -> PV for one (batch-block, q-tile)."""
    if has_mask:
        q_ref, k_ref, v_ref, mask_ref, o_ref, attn_ref = refs
    else:
        q_ref, k_ref, v_ref, o_ref, attn_ref = refs
        mask_ref = None

    q = q_ref[...]                                   # (bb, tq, D)
    if inv_scale is not None:
        # Fold 1/sqrt(d_k) into q: tq*D multiplies instead of tq*Sk on the score tile.
        q = q * jnp.asarray(inv_scale, dtype=q.dtype)
    k = k_ref[...]                                   # (bb, Sk, D)
    v = v_ref[...]                                   # (bb, Sk, Dv)

    # scores = q @ k^T, batched over the leading dim (contract feature dims, no transpose op).
    s = jax.lax.dot_general(q, k, (((2,), (2,)), ((0,), (0,))),
                            preferred_element_type=jnp.float32)   # (bb, tq, Sk)

    if mask_ref is not None:
        # Exact masked_fill(mask, -1e9) semantics (mask block may have a size-1 batch
        # dim; jnp.where broadcasting handles it).
        s = jnp.where(mask_ref[...] != 0, jnp.float32(-1e9), s)

    # Row softmax over the key axis, in f32 with max subtraction; reciprocal on EUP.
    m = jnp.max(s, axis=-1, keepdims=True)
    e = jnp.exp(s - m)
    denom = jnp.sum(e, axis=-1, keepdims=True)
    p = e * pl.reciprocal(denom, approx=True)

    # output = attn @ v (batched)
    o = jax.lax.dot_general(p.astype(v.dtype), v, (((2,), (1,)), ((0,), (0,))),
                            preferred_element_type=jnp.float32)   # (bb, tq, Dv)

    attn_ref[...] = p.astype(attn_ref.dtype)
    o_ref[...] = o.astype(o_ref.dtype)


def _vmem_footprint_bytes(bb, tq, Sk, D, Dv, itemsize, has_mask, bm_blk):
    """Rough per-step VMEM footprint: double-buffered blocks + live f32 score copies."""
    blocks = (bb * tq * D          # q tile
              + bb * Sk * D        # K resident
              + bb * Sk * Dv       # V resident
              + bb * tq * Dv       # output tile
              + bb * tq * Sk       # attn tile
              ) * itemsize
    if has_mask:
        blocks += bm_blk * tq * Sk  # int8 mask tile
    return 2 * blocks + 3 * bb * tq * Sk * 4


def _pick_blocks(B, Sq, Sk, D, Dv, itemsize, has_mask, Bm, block_q):
    """Choose (tq, bb): big q tiles, as many batches per step as fit the VMEM budget."""
    # Largest multiple-of-8 divisor of Sq that is <= block_q; full extent is the
    # always-legal fallback (only hit for small / awkward Sq).
    tq_cands = [d for d in range(min(Sq, block_q), 0, -1)
                if Sq % d == 0 and d % 8 == 0]
    if not tq_cands:
        tq_cands = [Sq]
    bb_cands = [d for d in range(B, 0, -1) if B % d == 0]
    for tq in tq_cands:
        for bb in bb_cands:
            bm_blk = 1 if Bm == 1 else bb
            if _vmem_footprint_bytes(bb, tq, Sk, D, Dv, itemsize,
                                     has_mask, bm_blk) <= _VMEM_BUDGET_BYTES:
                return tq, bb
    return tq_cands[-1], 1


def scaled_dot_product_attention(q, k, v, mask=None, *, scale=True, block_q=128):
    """q: [B, Sq, D]; k: [B, Sk, D]; v: [B, Sk, Dv]; mask: broadcastable to [B, Sq, Sk].

    Returns (output [B, Sq, Dv], attn [B, Sq, Sk]) matching the PyTorch module.
    """
    B, Sq, D = q.shape
    Bk, Sk, Dk = k.shape
    Bv, Sv, Dv = v.shape
    assert Bk == B and Bv == B and Dk == D and Sv == Sk

    itemsize = jnp.dtype(q.dtype).itemsize
    inv_scale = (1.0 / math.sqrt(D)) if scale else None
    has_mask = mask is not None

    # Normalize the mask: int8, keep a size-1 batch dim un-broadcast (less HBM traffic).
    mask_i8 = None
    Bm = 1
    if has_mask:
        m = jnp.asarray(mask)
        while m.ndim < 3:
            m = m[None]
        Bm = m.shape[0]
        if Bm not in (1, B):
            m = jnp.broadcast_to(m, (B,) + m.shape[1:])
            Bm = B
        mask_i8 = jnp.broadcast_to(m, (Bm, Sq, Sk)).astype(jnp.int8)

    tq, bb = _pick_blocks(B, Sq, Sk, D, Dv, itemsize, has_mask, Bm, block_q)
    bm_blk = 1 if Bm == 1 else bb
    grid = (B // bb, Sq // tq)

    inputs = [q, k, v]
    in_specs = [
        pl.BlockSpec((bb, tq, D), lambda b, i: (b, i, 0)),    # q tile
        pl.BlockSpec((bb, Sk, D), lambda b, i: (b, 0, 0)),    # K, resident per batch block
        pl.BlockSpec((bb, Sk, Dv), lambda b, i: (b, 0, 0)),   # V, resident per batch block
    ]
    if has_mask:
        inputs.append(mask_i8)
        if Bm == 1:
            in_specs.append(pl.BlockSpec((1, tq, Sk), lambda b, i: (0, i, 0)))
        else:
            in_specs.append(pl.BlockSpec((bb, tq, Sk), lambda b, i: (b, i, 0)))

    kernel = partial(_sdpa_kernel, inv_scale=inv_scale, has_mask=has_mask)

    out_bytes = B * Sq * Dv * itemsize + B * Sq * Sk * itemsize
    in_bytes = q.nbytes + k.nbytes + v.nbytes + (mask_i8.nbytes if has_mask else 0)
    cost = pl.CostEstimate(
        flops=2 * B * Sq * Sk * (D + Dv),
        transcendentals=B * Sq * Sk + B * Sq,
        bytes_accessed=in_bytes + out_bytes,
    )

    footprint = _vmem_footprint_bytes(bb, tq, Sk, D, Dv, itemsize, has_mask, bm_blk)
    vmem_limit = int(min(60 * 1024 * 1024, max(32 * 1024 * 1024, 2 * footprint)))

    out, attn = pl.pallas_call(
        kernel,
        out_shape=(
            jax.ShapeDtypeStruct((B, Sq, Dv), q.dtype),   # output
            jax.ShapeDtypeStruct((B, Sq, Sk), q.dtype),   # attention weights
        ),
        grid_spec=pltpu.PrefetchScalarGridSpec(
            num_scalar_prefetch=0,
            grid=grid,
            in_specs=in_specs,
            out_specs=(
                pl.BlockSpec((bb, tq, Dv), lambda b, i: (b, i, 0)),
                pl.BlockSpec((bb, tq, Sk), lambda b, i: (b, i, 0)),
            ),
        ),
        compiler_params=pltpu.CompilerParams(
            # Batch axis parallel (megacore shards it on v7x), q-tile axis arbitrary
            # so each core keeps its own K/V resident across q tiles.
            dimension_semantics=("parallel", "arbitrary"),
            vmem_limit_bytes=vmem_limit,
        ),
        cost_estimate=cost,
    )(*inputs)

    return out, attn


def _ref_sdpa(q, k, v, mask=None, scale=True):
    s = jnp.einsum("bqd,bkd->bqk", q, k)
    if scale:
        s = s / jnp.sqrt(jnp.asarray(k.shape[-1], s.dtype))
    if mask is not None:
        s = jnp.where(mask, jnp.float32(-1e9), s)
    a = jax.nn.softmax(s, axis=-1)
    return jnp.einsum("bqk,bkd->bqd", a, v), a


if __name__ == "__main__":
    # Small TFT-like shapes: Sk=128 keeps the attn store lane-dense; both batches are
    # processed in a single fat grid step.
    batch, seq_q, seq_k, d_k, d_v = 2, 128, 128, 32, 32

    key = jax.random.PRNGKey(0)
    kq, kk, kv = jax.random.split(key, 3)
    q = jax.random.normal(kq, (batch, seq_q, d_k), dtype=jnp.float32)
    k = jax.random.normal(kk, (batch, seq_k, d_k), dtype=jnp.float32)
    v = jax.random.normal(kv, (batch, seq_k, d_v), dtype=jnp.float32)

    # approx EUP reciprocal in the softmax normalization -> slightly looser tolerances.
    RTOL, ATOL = 5e-3, 5e-3

    # --- unmasked path (mask=None, dropoutRate=None) ---
    out, attn = scaled_dot_product_attention(q, k, v, mask=None, scale=True)
    out, attn = jax.block_until_ready((out, attn))
    out_exp, attn_exp = _ref_sdpa(q, k, v, mask=None, scale=True)
    np.testing.assert_allclose(np.asarray(attn), np.asarray(attn_exp), rtol=RTOL, atol=ATOL)
    np.testing.assert_allclose(np.asarray(out), np.asarray(out_exp), rtol=RTOL, atol=ATOL)

    # --- masked path: causal mask with batch dim 1 (stays un-broadcast, int8 DMA) ---
    causal = jnp.triu(jnp.ones((seq_q, seq_k), dtype=bool), k=1)[None]   # (1, Sq, Sk)
    out_m, attn_m = scaled_dot_product_attention(q, k, v, mask=causal, scale=True)
    out_m, attn_m = jax.block_until_ready((out_m, attn_m))
    out_exp_m, attn_exp_m = _ref_sdpa(q, k, v, mask=causal, scale=True)
    np.testing.assert_allclose(np.asarray(attn_m), np.asarray(attn_exp_m), rtol=RTOL, atol=ATOL)
    np.testing.assert_allclose(np.asarray(out_m), np.asarray(out_exp_m), rtol=RTOL, atol=ATOL)

    print("KERNEL_OK")
</pallas_src>

<mosaic_0001>
module attributes {stable_mosaic.version = 11 : i64} {
  func.func @_sdpa_kernel(%arg0: i32, %arg1: i32, %arg2: memref<2x128x32xf32, #tpu.memory_space<vmem>>, %arg3: memref<2x128x32xf32, #tpu.memory_space<vmem>>, %arg4: memref<2x128x32xf32, #tpu.memory_space<vmem>>, %arg5: memref<2x128x32xf32, #tpu.memory_space<vmem>>, %arg6: memref<2x128x128xf32, #tpu.memory_space<vmem>>) attributes {dimension_semantics = [#tpu.dimension_semantics<parallel>, #tpu.dimension_semantics<arbitrary>], iteration_bounds = array<i64: 1, 1>, scalar_prefetch = 0 : i64, scratch_operands = 0 : i64, tpu.core_type = #tpu.core_type<tc>, window_params = [{transform_indices = @transform_0, window_bounds = array<i64: 2, 128, 32>}, {transform_indices = @transform_1, window_bounds = array<i64: 2, 128, 32>}, {transform_indices = @transform_2, window_bounds = array<i64: 2, 128, 32>}, {transform_indices = @transform_3, window_bounds = array<i64: 2, 128, 32>}, {transform_indices = @transform_4, window_bounds = array<i64: 2, 128, 128>}]} {
    %c0 = arith.constant 0 : index
    %c0_0 = arith.constant 0 : index
    %c0_1 = arith.constant 0 : index
    %0 = vector.load %arg2[%c0, %c0_0, %c0_1] : memref<2x128x32xf32, #tpu.memory_space<vmem>>, vector<2x128x32xf32>
    %cst = arith.constant 0.176776692 : f32
    %1 = vector.broadcast %cst : f32 to vector<2x128x32xf32>
    %2 = arith.mulf %0, %1 : vector<2x128x32xf32>
    %c0_2 = arith.constant 0 : index
    %c0_3 = arith.constant 0 : index
    %c0_4 = arith.constant 0 : index
    %3 = vector.load %arg3[%c0_2, %c0_3, %c0_4] : memref<2x128x32xf32, #tpu.memory_space<vmem>>, vector<2x128x32xf32>
    %c0_5 = arith.constant 0 : index
    %c0_6 = arith.constant 0 : index
    %c0_7 = arith.constant 0 : index
    %4 = vector.load %arg4[%c0_5, %c0_6, %c0_7] : memref<2x128x32xf32, #tpu.memory_space<vmem>>, vector<2x128x32xf32>
    %cst_8 = arith.constant dense<0.000000e+00> : vector<2x128x128xf32>
    %5 = tpu.matmul %2, %3, %cst_8 {dimension_numbers = #tpu.dot_dimension_numbers<[2], [2], [1], [1], [0, 0, 0, 1, 1, 1], [0], [0]>} : vector<2x128x32xf32>, vector<2x128x32xf32>, vector<2x128x128xf32> -> vector<2x128x128xf32>
    %cst_9 = arith.constant dense<0xFF800000> : vector<2x128xf32>
    %6 = vector.multi_reduction <maximumf>, %5, %cst_9 [2] : vector<2x128x128xf32> to vector<2x128xf32>
    %7 = vector.shape_cast %6 : vector<2x128xf32> to vector<2x128x1xf32>
    %8 = vector.broadcast %7 : vector<2x128x1xf32> to vector<2x128x128xf32>
    %9 = arith.subf %5, %8 : vector<2x128x128xf32>
    %10 = math.exp %9 : vector<2x128x128xf32>
    %cst_10 = arith.constant dense<0.000000e+00> : vector<2x128xf32>
    %11 = vector.multi_reduction <add>, %10, %cst_10 [2] : vector<2x128x128xf32> to vector<2x128xf32>
    %12 = vector.shape_cast %11 : vector<2x128xf32> to vector<2x128x1xf32>
    %13 = tpu.reciprocal %12 {approx = true} : vector<2x128x1xf32> -> vector<2x128x1xf32>
    %14 = vector.broadcast %13 : vector<2x128x1xf32> to vector<2x128x128xf32>
    %15 = arith.mulf %10, %14 : vector<2x128x128xf32>
    %cst_11 = arith.constant dense<0.000000e+00> : vector<2x128x32xf32>
    %16 = tpu.matmul %15, %4, %cst_11 {dimension_numbers = #tpu.dot_dimension_numbers<[2], [1], [1], [2], [0, 0, 0, 1, 1, 2], [0], [0]>} : vector<2x128x128xf32>, vector<2x128x32xf32>, vector<2x128x32xf32> -> vector<2x128x32xf32>
    %c0_12 = arith.constant 0 : index
    %c0_13 = arith.constant 0 : index
    %c0_14 = arith.constant 0 : index
    %17 = vector.load %arg6[%c0_12, %c0_13, %c0_14] : memref<2x128x128xf32, #tpu.memory_space<vmem>>, vector<2x128x128xf32>
    tpu.vector_store %arg6[%c0_12, %c0_13, %c0_14], %15 {strides = array<i32>} : memref<2x128x128xf32, #tpu.memory_space<vmem>>, vector<2x128x128xf32>,
    %c0_15 = arith.constant 0 : index
    %c0_16 = arith.constant 0 : index
    %c0_17 = arith.constant 0 : index
    %18 = vector.load %arg5[%c0_15, %c0_16, %c0_17] : memref<2x128x32xf32, #tpu.memory_space<vmem>>, vector<2x128x32xf32>
    tpu.vector_store %arg5[%c0_15, %c0_16, %c0_17], %16 {strides = array<i32>} : memref<2x128x32xf32, #tpu.memory_space<vmem>>, vector<2x128x32xf32>,
    return
  }
  func.func @transform_0(%arg0: i32, %arg1: i32) -> (i32, i32, i32) {
    %c0_i32 = arith.constant 0 : i32
    %c0_i32_0 = arith.constant 0 : i32
    return %arg0, %arg1, %c0_i32 : i32, i32, i32
  }
  func.func @transform_1(%arg0: i32, %arg1: i32) -> (i32, i32, i32) {
    %c0_i32 = arith.constant 0 : i32
    %c0_i32_0 = arith.constant 0 : i32
    %c0_i32_1 = arith.constant 0 : i32
    return %arg0, %c0_i32, %c0_i32_0 : i32, i32, i32
  }
  func.func @transform_2(%arg0: i32, %arg1: i32) -> (i32, i32, i32) {
    %c0_i32 = arith.constant 0 : i32
    %c0_i32_0 = arith.constant 0 : i32
    %c0_i32_1 = arith.constant 0 : i32
    return %arg0, %c0_i32, %c0_i32_0 : i32, i32, i32
  }
  func.func @transform_3(%arg0: i32, %arg1: i32) -> (i32, i32, i32) {
    %c0_i32 = arith.constant 0 : i32
    %c0_i32_0 = arith.constant 0 : i32
    return %arg0, %arg1, %c0_i32 : i32, i32, i32
  }
  func.func @transform_4(%arg0: i32, %arg1: i32) -> (i32, i32, i32) {
    %c0_i32 = arith.constant 0 : i32
    %c0_i32_0 = arith.constant 0 : i32
    return %arg0, %arg1, %c0_i32 : i32, i32, i32
  }
}

</mosaic_0001>

<bundles_post_ra>
// kernel: tpu_custom_call.1
= control target key start
LH: loop header
LB: loop body
LE: loop exit
PB: predicated region body
PF: predicated region fallthrough
CT: control target
= control target key end

     0   :  { %vm145_vm0 = vcmask 261120   ;;  %s2658_s0 = inlined_call_operand.vmem [shape: f32[2,128,32], index: 0, kind: input, shape index: {}]   ;;  %s2659_s1 = inlined_call_operand.vmem [shape: f32[2,128,32], index: 1, kind: input, shape index: {}]   ;;  %s2660_s2 = inlined_call_operand.vmem [shape: f32[2,128,32], index: 2, kind: input, shape index: {}]   ;;  %s2661_s3 = inlined_call_operand.vmem [shape: f32[2,128,32], index: 3, kind: output, shape index: {0}]   ;;  %s2662_s4 = inlined_call_operand.hbm [shape: f32[2,128,128], index: 4, kind: output, shape index: {1}]  }
   0x1   :  { %v96_v0 = vld [vmem:[%s2659_s1 + $0x78] sm:$0xff]  ;;  %v95_v2 = vld [vmem:[%s2659_s1 + $0x70] sm:$0xff]  ;;  %v94_v4 = vld [vmem:[%s2659_s1 + $0x68] sm:$0xff] }
   0x2   :  { %v112_v1 = vld [vmem:[%s2659_s1 + $0xf8] sm:$0xff]  ;;  %1482 = vmatprep.subr.msk.mxu0 %vm145_vm0, %v96_v0  ;;  %v111_v3 = vld [vmem:[%s2659_s1 + $0xf0] sm:$0xff]  ;;  %v110_v5 = vld [vmem:[%s2659_s1 + $0xe8] sm:$0xff] }
   0x3   :  { %1538 = vmatprep.subr.msk.mxu1 %vm145_vm0, %v112_v1  ;;  %1483 = vmatpush3.xpose.msk.msra.mxu0 %vm145_vm0, %v96_v0  ;;  %v93_v6 = vld [vmem:[%s2659_s1 + $0x60] sm:$0xff]  ;;  %v92_v11 = vld [vmem:[%s2659_s1 + $0x58] sm:$0xff]  ;;  %v91_v14 = vld [vmem:[%s2659_s1 + $0x50] sm:$0xff] }
   0x4   :  { %1539 = vmatpush3.xpose.msk.msra.mxu1 %vm145_vm0, %v112_v1  ;;  %1484 = vmatprep.subr.msk.mxu0 %vm145_vm0, %v95_v2  ;;  %v109_v7 = vld [vmem:[%s2659_s1 + $0xe0] sm:$0xff]  ;;  %v108_v12 = vld [vmem:[%s2659_s1 + $0xd8] sm:$0xff]  ;;  %v107_v15 = vld [vmem:[%s2659_s1 + $0xd0] sm:$0xff] }
   0x5   :  { %1540 = vmatprep.subr.msk.mxu1 %vm145_vm0, %v111_v3  ;;  %v17_v8 = vld [vmem:[%s2658_s0] sm:$0xff]  ;;  %v90_v16 = vld [vmem:[%s2659_s1 + $0x48] sm:$0xff]  ;;  %v88_v20 = vld [vmem:[%s2659_s1 + $0x38] sm:$0xff] }
   0x6   :  { %v49_v9 = vmul.f32 0.17677669, %v17_v8  ;;  %v33_v10 = vld [vmem:[%s2658_s0 + $0x80] sm:$0xff]  ;;  %v106_v17 = vld [vmem:[%s2659_s1 + $0xc8] sm:$0xff]  ;;  %v104_v21 = vld [vmem:[%s2659_s1 + $0xb8] sm:$0xff] }
   0x7   :  { %1485 = vmatpush3.xpose.msk.msra.mxu0 %vm145_vm0, %v95_v2  ;;  %v65_v13 = vmul.f32 0.17677669, %v33_v10  ;;  %v89_v18 = vld [vmem:[%s2659_s1 + $0x40] sm:$0xff] }
   0x8   :  { %1541 = vmatpush3.xpose.msk.msra.mxu1 %vm145_vm0, %v111_v3  ;;  %1486 = vmatprep.subr.msk.mxu0 %vm145_vm0, %v94_v4  ;;  %v105_v19 = vld [vmem:[%s2659_s1 + $0xc0] sm:$0xff] }
   0x9   :  { %1542 = vmatprep.subr.msk.mxu1 %vm145_vm0, %v110_v5  ;;  %1514 = vmatprep.mubr.msk.f32.mxu0 %vm145_vm0, %v49_v9 }
   0xa   :  { %1570 = vmatprep.mubr.msk.f32.mxu1 %vm145_vm0, %v65_v13 }
   0xb   :  { %1487 = vmatpush3.xpose.msk.msra.mxu0 %vm145_vm0, %v94_v4 }
   0xc   :  { %1543 = vmatpush3.xpose.msk.msra.mxu1 %vm145_vm0, %v110_v5  ;;  %1488 = vmatprep.subr.msk.mxu0 %vm145_vm0, %v93_v6 }
   0xd   :  { %1544 = vmatprep.subr.msk.mxu1 %vm145_vm0, %v109_v7 }
   0xf   :  { %1489 = vmatpush3.xpose.msk.msra.mxu0 %vm145_vm0, %v93_v6 }
  0x10   :  { %1545 = vmatpush3.xpose.msk.msra.mxu1 %vm145_vm0, %v109_v7  ;;  %1490 = vmatprep.subr.msk.mxu0 %vm145_vm0, %v92_v11 }
  0x11   :  { %1546 = vmatprep.subr.msk.mxu1 %vm145_vm0, %v108_v12 }
  0x13   :  { %1491 = vmatpush3.xpose.msk.msra.mxu0 %vm145_vm0, %v92_v11 }
  0x14   :  { %1547 = vmatpush3.xpose.msk.msra.mxu1 %vm145_vm0, %v108_v12  ;;  %1492 = vmatprep.subr.msk.mxu0 %vm145_vm0, %v91_v14 }
  0x15   :  { %1548 = vmatprep.subr.msk.mxu1 %vm145_vm0, %v107_v15 }
  0x17   :  { %1493 = vmatpush3.xpose.msk.msra.mxu0 %vm145_vm0, %v91_v14 }
  0x18   :  { %1549 = vmatpush3.xpose.msk.msra.mxu1 %vm145_vm0, %v107_v15  ;;  %1494 = vmatprep.subr.msk.mxu0 %vm145_vm0, %v90_v16 }
  0x19   :  { %1550 = vmatprep.subr.msk.mxu1 %vm145_vm0, %v106_v17 }
  0x1b   :  { %1495 = vmatpush3.xpose.msk.msra.mxu0 %vm145_vm0, %v90_v16 }
  0x1c   :  { %1551 = vmatpush3.xpose.msk.msra.mxu1 %vm145_vm0, %v106_v17  ;;  %1496 = vmatprep.subr.msk.mxu0 %vm145_vm0, %v89_v18 }
  0x1d   :  { %1552 = vmatprep.subr.msk.mxu1 %vm145_vm0, %v105_v19 }
  0x1f   :  { %1497 = vmatpush3.xpose.msk.msra.mxu0 %vm145_vm0, %v89_v18 }
  0x20   :  { %1553 = vmatpush3.xpose.msk.msra.mxu1 %vm145_vm0, %v105_v19  ;;  %1498 = vmatprep.subr.msk.mxu0 %vm145_vm0, %v88_v20 }
  0x21   :  { %1554 = vmatprep.subr.msk.mxu1 %vm145_vm0, %v104_v21 }
  0x22   :  { %10 = vsyncpa [#allocation3], 0  ;;  %v87_v22 = vld [vmem:[%s2659_s1 + $0x30] sm:$0xff]  ;;  %v86_v24 = vld [vmem:[%s2659_s1 + $0x28] sm:$0xff] }
  0x23   :  { %v103_v23 = vld [vmem:[%s2659_s1 + $0xb0] sm:$0xff]  ;;  %1499 = vmatpush3.xpose.msk.msra.mxu0 %vm145_vm0, %v88_v20  ;;  %v102_v25 = vld [vmem:[%s2659_s1 + $0xa8] sm:$0xff]  ;;  %v85_v26 = vld [vmem:[%s2659_s1 + $0x20] sm:$0xff] }
  0x24   :  { %1555 = vmatpush3.xpose.msk.msra.mxu1 %vm145_vm0, %v104_v21  ;;  %1500 = vmatprep.subr.msk.mxu0 %vm145_vm0, %v87_v22  ;;  %v101_v27 = vld [vmem:[%s2659_s1 + $0xa0] sm:$0xff]  ;;  %v84_v28 = vld [vmem:[%s2659_s1 + $0x18] sm:$0xff]  ;;  %v83_v30 = vld [vmem:[%s2659_s1 + $0x10] sm:$0xff] }
  0x25   :  { %1556 = vmatprep.subr.msk.mxu1 %vm145_vm0, %v103_v23  ;;  %v100_v29 = vld [vmem:[%s2659_s1 + $0x98] sm:$0xff]  ;;  %v99_v31 = vld [vmem:[%s2659_s1 + $0x90] sm:$0xff]  ;;  %v82_v32 = vld [vmem:[%s2659_s1 + $0x8] sm:$0xff] }
  0x26   :  { %v98_v33 = vld [vmem:[%s2659_s1 + $0x88] sm:$0xff]  ;;  %v81_v34 = vld [vmem:[%s2659_s1] sm:$0xff]  ;;  %v35_v38 = vld [vmem:[%s2658_s0 + $0x90] sm:$0xff] }
  0x27   :  { %1501 = vmatpush3.xpose.msk.msra.mxu0 %vm145_vm0, %v87_v22  ;;  %v97_v35 = vld [vmem:[%s2659_s1 + $0x80] sm:$0xff]  ;;  %v18_v36 = vld [vmem:[%s2658_s0 + $0x8] sm:$0xff]  ;;  %v19_v39 = vld [vmem:[%s2658_s0 + $0x10] sm:$0xff]  ;;  %v67_v42 = vmul.f32 0.17677669, %v35_v38 }
  0x28   :  { %1557 = vmatpush3.xpose.msk.msra.mxu1 %vm145_vm0, %v103_v23  ;;  %1502 = vmatprep.subr.msk.mxu0 %vm145_vm0, %v86_v24  ;;  %v34_v37 = vld [vmem:[%s2658_s0 + $0x88] sm:$0xff]  ;;  %v50_v40 = vmul.f32 0.17677669, %v18_v36  ;;  %v36_v43 = vld [vmem:[%s2658_s0 + $0x98] sm:$0xff]  ;;  %v51_v44 = vmul.f32 0.17677669, %v19_v39 }
  0x29   :  { %1558 = vmatprep.subr.msk.mxu1 %vm145_vm0, %v102_v25  ;;  %v66_v41 = vmul.f32 0.17677669, %v34_v37  ;;  %v20_v45 = vld [vmem:[%s2658_s0 + $0x18] sm:$0xff]  ;;  %v37_v46 = vld [vmem:[%s2658_s0 + $0xa0] sm:$0xff]  ;;  %v68_v48 = vmul.f32 0.17677669, %v36_v43 }
  0x2a   :  { %v21_v47 = vld [vmem:[%s2658_s0 + $0x20] sm:$0xff]  ;;  %v52_v49 = vmul.f32 0.17677669, %v20_v45  ;;  %v69_v50 = vmul.f32 0.17677669, %v37_v46  ;;  %v38_v51 = vld [vmem:[%s2658_s0 + $0xa8] sm:$0xff] }
  0x2b   :  { %1503 = vmatpush3.xpose.msk.msra.mxu0 %vm145_vm0, %v86_v24  ;;  %v53_v52 = vmul.f32 0.17677669, %v21_v47  ;;  %v22_v53 = vld [vmem:[%s2658_s0 + $0x28] sm:$0xff]  ;;  %v39_v54 = vld [vmem:[%s2658_s0 + $0xb0] sm:$0xff]  ;;  %v70_v56 = vmul.f32 0.17677669, %v38_v51 }
  0x2c   :  { %1559 = vmatpush3.xpose.msk.msra.mxu1 %vm145_vm0, %v102_v25  ;;  %1504 = vmatprep.subr.msk.mxu0 %vm145_vm0, %v85_v26  ;;  %v23_v55 = vld [vmem:[%s2658_s0 + $0x30] sm:$0xff]  ;;  %v54_v57 = vmul.f32 0.17677669, %v22_v53  ;;  %v71_v58 = vmul.f32 0.17677669, %v39_v54  ;;  %v40_v59 = vld [vmem:[%s2658_s0 + $0xb8] sm:$0xff] }
  0x2d   :  { %1560 = vmatprep.subr.msk.mxu1 %vm145_vm0, %v101_v27  ;;  %v55_v60 = vmul.f32 0.17677669, %v23_v55  ;;  %v24_v61 = vld [vmem:[%s2658_s0 + $0x38] sm:$0xff]  ;;  %v41_v62 = vld [vmem:[%s2658_s0 + $0xc0] sm:$0xff]  ;;  %v72_v0 = vmul.f32 0.17677669, %v40_v59 }
  0x2e   :  { %v25_v63 = vld [vmem:[%s2658_s0 + $0x40] sm:$0xff]  ;;  %v56_v1 = vmul.f32 0.17677669, %v24_v61  ;;  %v73_v2 = vmul.f32 0.17677669, %v41_v62  ;;  %v42_v3 = vld [vmem:[%s2658_s0 + $0xc8] sm:$0xff] }
  0x2f   :  { %1505 = vmatpush3.xpose.msk.msra.mxu0 %vm145_vm0, %v85_v26  ;;  %v57_v4 = vmul.f32 0.17677669, %v25_v63  ;;  %v26_v5 = vld [vmem:[%s2658_s0 + $0x48] sm:$0xff]  ;;  %v43_v6 = vld [vmem:[%s2658_s0 + $0xd0] sm:$0xff]  ;;  %v74_v8 = vmul.f32 0.17677669, %v42_v3 }
  0x30   :  { %1561 = vmatpush3.xpose.msk.msra.mxu1 %vm145_vm0, %v101_v27  ;;  %1506 = vmatprep.subr.msk.mxu0 %vm145_vm0, %v84_v28  ;;  %v27_v7 = vld [vmem:[%s2658_s0 + $0x50] sm:$0xff]  ;;  %v58_v9 = vmul.f32 0.17677669, %v26_v5  ;;  %v75_v10 = vmul.f32 0.17677669, %v43_v6  ;;  %v44_v11 = vld [vmem:[%s2658_s0 + $0xd8] sm:$0xff] }
  0x31   :  { %1562 = vmatprep.subr.msk.mxu1 %vm145_vm0, %v100_v29  ;;  %v59_v12 = vmul.f32 0.17677669, %v27_v7  ;;  %v28_v13 = vld [vmem:[%s2658_s0 + $0x58] sm:$0xff]  ;;  %v45_v14 = vld [vmem:[%s2658_s0 + $0xe0] sm:$0xff]  ;;  %v76_v16 = vmul.f32 0.17677669, %v44_v11 }
  0x32   :  { %v29_v15 = vld [vmem:[%s2658_s0 + $0x60] sm:$0xff]  ;;  %v60_v17 = vmul.f32 0.17677669, %v28_v13  ;;  %v77_v18 = vmul.f32 0.17677669, %v45_v14  ;;  %v46_v19 = vld [vmem:[%s2658_s0 + $0xe8] sm:$0xff] }
  0x33   :  { %1507 = vmatpush3.xpose.msk.msra.mxu0 %vm145_vm0, %v84_v28  ;;  %v61_v20 = vmul.f32 0.17677669, %v29_v15  ;;  %v30_v21 = vld [vmem:[%s2658_s0 + $0x68] sm:$0xff]  ;;  %v47_v22 = vld [vmem:[%s2658_s0 + $0xf0] sm:$0xff]  ;;  %v78_v24 = vmul.f32 0.17677669, %v46_v19 }
  0x34   :  { %1563 = vmatpush3.xpose.msk.msra.mxu1 %vm145_vm0, %v100_v29  ;;  %1508 = vmatprep.subr.msk.mxu0 %vm145_vm0, %v83_v30  ;;  %v31_v23 = vld [vmem:[%s2658_s0 + $0x70] sm:$0xff]  ;;  %v62_v25 = vmul.f32 0.17677669, %v30_v21  ;;  %v79_v26 = vmul.f32 0.17677669, %v47_v22  ;;  %v48_v27 = vld [vmem:[%s2658_s0 + $0xf8] sm:$0xff] }
  0x35   :  { %1564 = vmatprep.subr.msk.mxu1 %vm145_vm0, %v99_v31  ;;  %v63_v28 = vmul.f32 0.17677669, %v31_v23  ;;  %v32_v29 = vld [vmem:[%s2658_s0 + $0x78] sm:$0xff]  ;;  %v143_v3 = vld [vmem:[%s2660_s2 + $0xf0] sm:$0xff]  ;;  %v142_v5 = vld [vmem:[%s2660_s2 + $0xe8] sm:$0xff] }
  0x36   :  { %v125_v6 = vld [vmem:[%s2660_s2 + $0x60] sm:$0xff] }
  0x37   :  { %1509 = vmatpush3.xpose.msk.msra.mxu0 %vm145_vm0, %v83_v30  ;;  %v80_v30 = vmul.f32 0.17677669, %v48_v27  ;;  %v141_v7 = vld [vmem:[%s2660_s2 + $0xe0] sm:$0xff] }
  0x38   :  { %1565 = vmatpush3.xpose.msk.msra.mxu1 %vm145_vm0, %v99_v31  ;;  %1510 = vmatprep.subr.msk.mxu0 %vm145_vm0, %v82_v32  ;;  %v64_v31 = vmul.f32 0.17677669, %v32_v29 }
  0x39   :  { %1566 = vmatprep.subr.msk.mxu1 %vm145_vm0, %v98_v33 }
  0x3b   :  { %1511 = vmatpush3.xpose.msk.msra.mxu0 %vm145_vm0, %v82_v32 }
  0x3c   :  { %1567 = vmatpush3.xpose.msk.msra.mxu1 %vm145_vm0, %v98_v33  ;;  %1512 = vmatprep.subr.msk.mxu0 %vm145_vm0, %v81_v34 }
  0x3d   :  { %1568 = vmatprep.subr.msk.mxu1 %vm145_vm0, %v97_v35 }
  0x3f   :  { %1513 = vmatpush3.xpose.msk.msra.mxu0 %vm145_vm0, %v81_v34 }
  0x40   :  { %1569 = vmatpush3.xpose.msk.msra.mxu1 %vm145_vm0, %v97_v35 }
  0x42   :  { %1515 = vmatmul.mubr.msk.f32.vlgmr.msra.gmra.mxu0 %vm145_vm0, %v50_v40 }
  0x43   :  { %1571 = vmatmul.mubr.msk.f32.vlgmr.msra.gmra.mxu1 %vm145_vm0, %v66_v41  ;;  %1517 = vmatprep.mubr.msk.f32.mxu0 %vm145_vm0, %v51_v44 }
  0x44   :  { %1573 = vmatprep.mubr.msk.f32.mxu1 %vm145_vm0, %v67_v42 }
  0x46   :  { %1518 = vmatmul.mubr.msk.f32.gmra.mxu0 %vm145_vm0, %v52_v49 }
  0x47   :  { %1574 = vmatmul.mubr.msk.f32.gmra.mxu1 %vm145_vm0, %v68_v48  ;;  %1520 = vmatprep.mubr.msk.f32.mxu0 %vm145_vm0, %v53_v52 }
  0x48   :  { %1576 = vmatprep.mubr.msk.f32.mxu1 %vm145_vm0, %v69_v50 }
  0x4a   :  { %1521 = vmatmul.mubr.msk.f32.gmra.mxu0 %vm145_vm0, %v54_v57 }
  0x4b   :  { %1577 = vmatmul.mubr.msk.f32.gmra.mxu1 %vm145_vm0, %v70_v56  ;;  %1523 = vmatprep.mubr.msk.f32.mxu0 %vm145_vm0, %v55_v60 }
  0x4c   :  { %1579 = vmatprep.mubr.msk.f32.mxu1 %vm145_vm0, %v71_v58 }
  0x4e   :  { %1524 = vmatmul.mubr.msk.f32.gmra.mxu0 %vm145_vm0, %v56_v1  ;;  %v127_v1 = vld [vmem:[%s2660_s2 + $0x70] sm:$0xff] }
  0x4f   :  { %1580 = vmatmul.mubr.msk.f32.gmra.mxu1 %vm145_vm0, %v72_v0  ;;  %1526 = vmatprep.mubr.msk.f32.mxu0 %vm145_vm0, %v57_v4  ;;  %v128_v0 = vld [vmem:[%s2660_s2 + $0x78] sm:$0xff]  ;;  %v126_v4 = vld [vmem:[%s2660_s2 + $0x68] sm:$0xff] }
  0x50   :  { %1582 = vmatprep.mubr.msk.f32.mxu1 %vm145_vm0, %v73_v2  ;;  %1594 = vmatprep.subr.mxu0 %v128_v0  ;;  %v144_v2 = vld [vmem:[%s2660_s2 + $0xf8] sm:$0xff] }
  0x51   :  { %1595 = vmatpush3.msra.mxu0 %v128_v0  ;;  %1650 = vmatprep.subr.mxu1 %v144_v2 }
  0x52   :  { %1527 = vmatmul.mubr.msk.f32.gmra.mxu0 %vm145_vm0, %v58_v9  ;;  %1596 = vmatprep.subr.mxu0 %v127_v1  ;;  %v123_v9 = vld [vmem:[%s2660_s2 + $0x50] sm:$0xff] }
  0x53   :  { %1583 = vmatmul.mubr.msk.f32.gmra.mxu1 %vm145_vm0, %v74_v8  ;;  %1529 = vmatprep.mubr.msk.f32.mxu0 %vm145_vm0, %v59_v12  ;;  %v124_v8 = vld [vmem:[%s2660_s2 + $0x58] sm:$0xff] }
  0x54   :  { %1585 = vmatprep.mubr.msk.f32.mxu1 %vm145_vm0, %v75_v10  ;;  %1651 = vmatpush3.msra.mxu1 %v144_v2 }
  0x55   :  { %1597 = vmatpush3.msra.mxu0 %v127_v1  ;;  %1652 = vmatprep.subr.mxu1 %v143_v3 }
  0x56   :  { %1530 = vmatmul.mubr.msk.f32.gmra.mxu0 %vm145_vm0, %v60_v17  ;;  %1598 = vmatprep.subr.mxu0 %v126_v4 }
  0x57   :  { %1586 = vmatmul.mubr.msk.f32.gmra.mxu1 %vm145_vm0, %v76_v16  ;;  %1532 = vmatprep.mubr.msk.f32.mxu0 %vm145_vm0, %v61_v20 }
  0x58   :  { %1588 = vmatprep.mubr.msk.f32.mxu1 %vm145_vm0, %v77_v18  ;;  %1653 = vmatpush3.msra.mxu1 %v143_v3 }
  0x59   :  { %1599 = vmatpush3.msra.mxu0 %v126_v4  ;;  %1654 = vmatprep.subr.mxu1 %v142_v5 }
  0x5a   :  { %1533 = vmatmul.mubr.msk.f32.gmra.mxu0 %vm145_vm0, %v62_v25  ;;  %1600 = vmatprep.subr.mxu0 %v125_v6 }
  0x5b   :  { %1589 = vmatmul.mubr.msk.f32.gmra.mxu1 %vm145_vm0, %v78_v24  ;;  %1535 = vmatprep.mubr.msk.f32.mxu0 %vm145_vm0, %v63_v28 }
  0x5c   :  { %1591 = vmatprep.mubr.msk.f32.mxu1 %vm145_vm0, %v79_v26  ;;  %1655 = vmatpush3.msra.mxu1 %v142_v5 }
  0x5d   :  { %1601 = vmatpush3.msra.mxu0 %v125_v6  ;;  %1656 = vmatprep.subr.mxu1 %v141_v7 }
  0x5e   :  { %1536 = vmatmul.mubr.msk.f32.gmra.mxu0 %vm145_vm0, %v64_v31  ;;  %1602 = vmatprep.subr.mxu0 %v124_v8 }
  0x5f   :  { %1592 = vmatmul.mubr.msk.f32.gmra.mxu1 %vm145_vm0, %v80_v30  ;;  %1603 = vmatpush3.msra.mxu0 %v124_v8 }
  0x60   :  { %1657 = vmatpush3.msra.mxu1 %v141_v7  ;;  %1604 = vmatprep.subr.mxu0 %v123_v9 }
  0x61   :  { %1605 = vmatpush3.msra.mxu0 %v123_v9 }
 0x102   :  { %v2175_v32 = vpop.f32.mrf.mxu0 }
 0x103   :  { %v2177_v33 = vpop.f32.mrf.mxu1  ;;  %630 = vmax.xlane.f32.xlu1 %v2175_v32 }
 0x104   :  { %v2180_v34 = vpop.f32.mrf.mxu0 }
 0x105   :  { %628 = vmax.xlane.f32.xlu0 %v2180_v34  ;;  %v2183_v35 = vpop.f32.mrf.mxu1 }
 0x106   :  { %v2189_v37 = vpop.f32.mrf.mxu0 }
 0x107   :  { %662 = vmax.xlane.f32.xlu1 %v2177_v33  ;;  %v2186_v36 = vpop.f32.mrf.mxu1 }
 0x108   :  { %v2196_v39 = vpop.f32.mrf.mxu0 }
 0x109   :  { %660 = vmax.xlane.f32.xlu0 %v2183_v35  ;;  %v2192_v38 = vpop.f32.mrf.mxu1 }
 0x10a   :  { %v2201_v41 = vpop.f32.mrf.mxu0 }
 0x10b   :  { %666 = vmax.xlane.f32.xlu1 %v2186_v36  ;;  %v2198_v40 = vpop.f32.mrf.mxu1 }
 0x10c   :  { %v2208_v43 = vpop.f32.mrf.mxu0 }
 0x10d   :  { %634 = vmax.xlane.f32.xlu0 %v2189_v37  ;;  %v2204_v42 = vpop.f32.mrf.mxu1 }
 0x10e   :  { %v2213_v45 = vpop.f32.mrf.mxu0 }
 0x10f   :  { %664 = vmax.xlane.f32.xlu1 %v2192_v38  ;;  %v2210_v44 = vpop.f32.mrf.mxu1 }
 0x110   :  { %v2220_v47 = vpop.f32.mrf.mxu0 }
 0x111   :  { %632 = vmax.xlane.f32.xlu0 %v2196_v39  ;;  %v2216_v46 = vpop.f32.mrf.mxu1 }
 0x112   :  { %v2225_v49 = vpop.f32.mrf.mxu0 }
 0x113   :  { %670 = vmax.xlane.f32.xlu1 %v2198_v40  ;;  %v2222_v48 = vpop.f32.mrf.mxu1 }
 0x114   :  { %v2232_v51 = vpop.f32.mrf.mxu0 }
 0x115   :  { %638 = vmax.xlane.f32.xlu0 %v2201_v41  ;;  %v2228_v50 = vpop.f32.mrf.mxu1 }
 0x116   :  { %v2237_v53 = vpop.f32.mrf.mxu0 }
 0x117   :  { %668 = vmax.xlane.f32.xlu1 %v2204_v42  ;;  %v2234_v52 = vpop.f32.mrf.mxu1 }
 0x118   :  { %v2243_v55 = vpop.f32.mrf.mxu0 }
 0x119   :  { %636 = vmax.xlane.f32.xlu0 %v2208_v43  ;;  %v2240_v54 = vpop.f32.mrf.mxu1 }
 0x11a   :  { %v2248_v57 = vpop.f32.mrf.mxu0 }
 0x11b   :  { %674 = vmax.xlane.f32.xlu1 %v2210_v44  ;;  %v2245_v56 = vpop.f32.mrf.mxu1 }
 0x11c   :  { %v2254_v59 = vpop.f32.mrf.mxu0 }
 0x11d   :  { %642 = vmax.xlane.f32.xlu0 %v2213_v45  ;;  %v2250_v58 = vpop.f32.mrf.mxu1 }
 0x11e   :  { %v2259_v61 = vpop.f32.mrf.mxu0 }
 0x11f   :  { %672 = vmax.xlane.f32.xlu1 %v2216_v46  ;;  %v2256_v60 = vpop.f32.mrf.mxu1 }
 0x120   :  { %v2265_v63 = vpop.f32.mrf.mxu0 }
 0x121   :  { %640 = vmax.xlane.f32.xlu0 %v2220_v47  ;;  %v2262_v62 = vpop.f32.mrf.mxu1 }
 0x123   :  { %678 = vmax.xlane.f32.xlu1 %v2222_v48 }
 0x125   :  { %646 = vmax.xlane.f32.xlu0 %v2225_v49 }
 0x127   :  { %676 = vmax.xlane.f32.xlu1 %v2228_v50 }
 0x129   :  { %644 = vmax.xlane.f32.xlu0 %v2232_v51 }
 0x12b   :  { %682 = vmax.xlane.f32.xlu1 %v2234_v52 }
 0x12d   :  { %650 = vmax.xlane.f32.xlu0 %v2237_v53 }
 0x12f   :  { %680 = vmax.xlane.f32.xlu1 %v2240_v54 }
 0x131   :  { %648 = vmax.xlane.f32.xlu0 %v2243_v55 }
 0x133   :  { %686 = vmax.xlane.f32.xlu1 %v2245_v56 }
 0x135   :  { %654 = vmax.xlane.f32.xlu0 %v2248_v57 }
 0x137   :  { %684 = vmax.xlane.f32.xlu1 %v2250_v58 }
 0x139   :  { %652 = vmax.xlane.f32.xlu0 %v2254_v59 }
 0x13b   :  { %688 = vmax.xlane.f32.xlu1 %v2262_v62 }
 0x13d   :  { %656 = vmax.xlane.f32.xlu0 %v2265_v63 }
 0x13f   :  { %690 = vmax.xlane.f32.xlu1 %v2256_v60 }
 0x141   :  { %658 = vmax.xlane.f32.xlu0 %v2259_v61 }
 0x18c   :  { %v631_v10 = vpop.xlane.xlu1 %630 }
 0x18d   :  { %v693_v11 = vsub.f32 %v2175_v32, %v631_v10 }
 0x18e   :  { %v629_v12 = vpop.xlane.xlu0 %628 }
 0x18f   :  { %v726_v13 = vmul.f32 1.442695, %v693_v11  ;;  %v692_v14 = vsub.f32 %v2180_v34, %v629_v12 }
 0x190   :  { %v663_v15 = vpop.xlane.xlu1 %662 }
 0x191   :  { %1709 = vpow2.f32 %v726_v13  ;;  %v724_v16 = vmul.f32 1.442695, %v692_v14  ;;  %v709_v17 = vsub.f32 %v2177_v33, %v663_v15  ;;  %v121_v15 = vld [vmem:[%s2660_s2 + $0x40] sm:$0xff] }
 0x192   :  { %v661_v18 = vpop.xlane.xlu0 %660 }
 0x193   :  { %v758_v19 = vmul.f32 1.442695, %v709_v17  ;;  %v708_v20 = vsub.f32 %v2183_v35, %v661_v18  ;;  %1711 = vpow2.f32 %v724_v16 }
 0x194   :  { %v667_v21 = vpop.xlane.xlu1 %666 }
 0x195   :  { %1713 = vpow2.f32 %v758_v19  ;;  %v756_v22 = vmul.f32 1.442695, %v708_v20  ;;  %v711_v23 = vsub.f32 %v2186_v36, %v667_v21 }
 0x196   :  { %v635_v24 = vpop.xlane.xlu0 %634 }
 0x197   :  { %v695_v25 = vsub.f32 %v2189_v37, %v635_v24  ;;  %1715 = vpow2.f32 %v756_v22  ;;  %v762_v27 = vmul.f32 1.442695, %v711_v23 }
 0x198   :  { %v665_v26 = vpop.xlane.xlu1 %664 }
 0x199   :  { %v730_v28 = vmul.f32 1.442695, %v695_v25  ;;  %v710_v29 = vsub.f32 %v2192_v38, %v665_v26  ;;  %v138_v26 = vld [vmem:[%s2660_s2 + $0xc8] sm:$0xff] }
 0x19a   :  { %v633_v30 = vpop.xlane.xlu0 %632 }
 0x19b   :  { %1717 = vpow2.f32 %v730_v28  ;;  %v694_v31 = vsub.f32 %v2196_v39, %v633_v30  ;;  %v760_v33 = vmul.f32 1.442695, %v710_v29  ;;  %v137_v28 = vld [vmem:[%s2660_s2 + $0xc0] sm:$0xff] }
 0x19c   :  { %v671_v32 = vpop.xlane.xlu1 %670  ;;  %1719 = vpow2.f32 %v762_v27 }
 0x19d   :  { %v728_v34 = vmul.f32 1.442695, %v694_v31  ;;  %v713_v35 = vsub.f32 %v2198_v40, %v671_v32 }
 0x19e   :  { %v2310_v36 = vpop.eup %1709  ;;  %v639_v0 = vpop.xlane.xlu0 %638 }
 0x19f   :  { %1721 = vpow2.f32 %v728_v34  ;;  %v697_v37 = vsub.f32 %v2201_v41, %v639_v0  ;;  %790 = vadd.xlane.f32.xlu0 %v2310_v36  ;;  %v766_v2 = vmul.f32 1.442695, %v713_v35  ;;  %v136_v0 = vld [vmem:[%s2660_s2 + $0xb8] sm:$0xff] }
 0x1a0   :  { %v669_v1 = vpop.xlane.xlu1 %668  ;;  %v2314_v38 = vpop.eup %1711  ;;  %1723 = vpow2.f32 %v760_v33  ;;  %v118_v33 = vld [vmem:[%s2660_s2 + $0x28] sm:$0xff] }
 0x1a1   :  { %v734_v39 = vmul.f32 1.442695, %v697_v37  ;;  %v712_v3 = vsub.f32 %v2204_v42, %v669_v1 }
 0x1a2   :  { %v2317_v4 = vpop.eup %1713  ;;  %v637_v5 = vpop.xlane.xlu0 %636 }
 0x1a3   :  { %1725 = vpow2.f32 %v734_v39  ;;  %v696_v40 = vsub.f32 %v2208_v43, %v637_v5  ;;  %822 = vadd.xlane.f32.xlu1 %v2317_v4  ;;  %788 = vadd.xlane.f32.xlu0 %v2314_v38  ;;  %v764_v6 = vmul.f32 1.442695, %v712_v3 }
 0x1a4   :  { %v675_v41 = vpop.xlane.xlu1 %674  ;;  %1727 = vpow2.f32 %v766_v2  ;;  %v2323_v9 = vpop.eup %1715  ;;  %v117_v2 = vld [vmem:[%s2660_s2 + $0x20] sm:$0xff] }
 0x1a5   :  { %v732_v7 = vmul.f32 1.442695, %v696_v40  ;;  %v715_v8 = vsub.f32 %v2210_v44, %v675_v41  ;;  %v122_v44 = vld [vmem:[%s2660_s2 + $0x48] sm:$0xff] }
 0x1a6   :  { %v643_v10 = vpop.xlane.xlu0 %642  ;;  %1606 = vmatprep.subr.mxu0 %v122_v44 }
 0x1a7   :  { %1729 = vpow2.f32 %v732_v7  ;;  %v699_v42 = vsub.f32 %v2213_v45, %v643_v10  ;;  %820 = vadd.xlane.f32.xlu1 %v2323_v9  ;;  %v770_v43 = vmul.f32 1.442695, %v715_v8  ;;  %v140_v45 = vld [vmem:[%s2660_s2 + $0xd8] sm:$0xff]  ;;  %1607 = vmatpush3.msra.mxu0 %v122_v44  ;;  %v134_v7 = vld [vmem:[%s2660_s2 + $0xa8] sm:$0xff]  ;;  %v133_v44 = vld [vmem:[%s2660_s2 + $0xa0] sm:$0xff] }
 0x1a8   :  { %v2327_v11 = vpop.eup %1717  ;;  %v673_v12 = vpop.xlane.xlu1 %672  ;;  %1731 = vpow2.f32 %v764_v6  ;;  %1658 = vmatprep.subr.mxu1 %v140_v45  ;;  %1608 = vmatprep.subr.mxu0 %v121_v15 }
 0x1a9   :  { %v738_v13 = vmul.f32 1.442695, %v699_v42  ;;  %v714_v14 = vsub.f32 %v2216_v46, %v673_v12  ;;  %794 = vadd.xlane.f32.xlu0 %v2327_v11  ;;  %v2340_v16 = vpop.eup %1719  ;;  %v139_v46 = vld [vmem:[%s2660_s2 + $0xd0] sm:$0xff]  ;;  %1659 = vmatpush3.msra.mxu1 %v140_v45 }
 0x1aa   :  { %v641_v17 = vpop.xlane.xlu0 %640  ;;  %1660 = vmatprep.subr.mxu1 %v139_v46  ;;  %1609 = vmatpush3.msra.mxu0 %v121_v15  ;;  %v115_v12 = vld [vmem:[%s2660_s2 + $0x10] sm:$0xff] }
 0x1ab   :  { %1733 = vpow2.f32 %v738_v13  ;;  %v698_v18 = vsub.f32 %v2220_v47, %v641_v17  ;;  %826 = vadd.xlane.f32.xlu1 %v2340_v16  ;;  %v768_v21 = vmul.f32 1.442695, %v714_v14  ;;  %1661 = vmatpush3.msra.mxu1 %v139_v46  ;;  %v120_v47 = vld [vmem:[%s2660_s2 + $0x38] sm:$0xff]  ;;  %v114_v17 = vld [vmem:[%s2660_s2 + $0x8] sm:$0xff] }
 0x1ac   :  { %v2347_v19 = vpop.eup %1721  ;;  %v679_v20 = vpop.xlane.xlu1 %678  ;;  %1735 = vpow2.f32 %v770_v43  ;;  %1610 = vmatprep.subr.mxu0 %v120_v47  ;;  %1662 = vmatprep.subr.mxu1 %v138_v26 }
 0x1ad   :  { %v736_v22 = vmul.f32 1.442695, %v698_v18  ;;  %v717_v23 = vsub.f32 %v2222_v48, %v679_v20  ;;  %792 = vadd.xlane.f32.xlu0 %v2347_v19  ;;  %v2351_v24 = vpop.eup %1723  ;;  %v119_v48 = vld [vmem:[%s2660_s2 + $0x30] sm:$0xff]  ;;  %1611 = vmatpush3.msra.mxu0 %v120_v47 }
 0x1ae   :  { %v647_v25 = vpop.xlane.xlu0 %646  ;;  %1663 = vmatpush3.msra.mxu1 %v138_v26  ;;  %1612 = vmatprep.subr.mxu0 %v119_v48 }
 0x1af   :  { %1737 = vpow2.f32 %v736_v22  ;;  %v701_v27 = vsub.f32 %v2225_v49, %v647_v25  ;;  %824 = vadd.xlane.f32.xlu1 %v2351_v24  ;;  %v774_v31 = vmul.f32 1.442695, %v717_v23  ;;  %1664 = vmatprep.subr.mxu1 %v137_v28  ;;  %v131_v25 = vld [vmem:[%s2660_s2 + $0x90] sm:$0xff] }
 0x1b0   :  { %v2367_v29 = vpop.eup %1725  ;;  %v677_v30 = vpop.xlane.xlu1 %676  ;;  %1739 = vpow2.f32 %v768_v21  ;;  %1613 = vmatpush3.msra.mxu0 %v119_v48  ;;  %1665 = vmatpush3.msra.mxu1 %v137_v28 }
 0x1b1   :  { %v742_v32 = vmul.f32 1.442695, %v701_v27  ;;  %v716_v49 = vsub.f32 %v2228_v50, %v677_v30  ;;  %798 = vadd.xlane.f32.xlu0 %v2367_v29  ;;  %v2374_v34 = vpop.eup %1727  ;;  %1614 = vmatprep.subr.mxu0 %v118_v33 }
 0x1b2   :  { %v645_v35 = vpop.xlane.xlu0 %644  ;;  %1666 = vmatprep.subr.mxu1 %v136_v0  ;;  %1615 = vmatpush3.msra.mxu0 %v118_v33  ;;  %v129_v33 = vld [vmem:[%s2660_s2 + $0x80] sm:$0xff] }
 0x1b3   :  { %1741 = vpow2.f32 %v742_v32  ;;  %v700_v37 = vsub.f32 %v2232_v51, %v645_v35  ;;  %830 = vadd.xlane.f32.xlu1 %v2374_v34  ;;  %v772_v39 = vmul.f32 1.442695, %v716_v49  ;;  %v135_v51 = vld [vmem:[%s2660_s2 + $0xb0] sm:$0xff]  ;;  %1667 = vmatpush3.msra.mxu1 %v136_v0 }
 0x1b4   :  { %v2381_v50 = vpop.eup %1729  ;;  %v683_v1 = vpop.xlane.xlu1 %682  ;;  %1743 = vpow2.f32 %v774_v31  ;;  %1616 = vmatprep.subr.mxu0 %v117_v2  ;;  %1668 = vmatprep.subr.mxu1 %v135_v51  ;;  %v130_v31 = vld [vmem:[%s2660_s2 + $0x88] sm:$0xff] }
 0x1b5   :  { %v740_v3 = vmul.f32 1.442695, %v700_v37  ;;  %v719_v5 = vsub.f32 %v2234_v52, %v683_v1  ;;  %796 = vadd.xlane.f32.xlu0 %v2381_v50  ;;  %v2391_v40 = vpop.eup %1731  ;;  %v116_v52 = vld [vmem:[%s2660_s2 + $0x18] sm:$0xff]  ;;  %1617 = vmatpush3.msra.mxu0 %v117_v2 }
 0x1b6   :  { %v651_v41 = vpop.xlane.xlu0 %650  ;;  %1669 = vmatpush3.msra.mxu1 %v135_v51  ;;  %1618 = vmatprep.subr.mxu0 %v116_v52 }
 0x1b7   :  { %1745 = vpow2.f32 %v740_v3  ;;  %v703_v6 = vsub.f32 %v2237_v53, %v651_v41  ;;  %828 = vadd.xlane.f32.xlu1 %v2391_v40  ;;  %v778_v42 = vmul.f32 1.442695, %v719_v5  ;;  %1670 = vmatprep.subr.mxu1 %v134_v7 }
 0x1b8   :  { %v2401_v8 = vpop.eup %1733  ;;  %v681_v10 = vpop.xlane.xlu1 %680  ;;  %1747 = vpow2.f32 %v772_v39  ;;  %1619 = vmatpush3.msra.mxu0 %v116_v52  ;;  %1671 = vmatpush3.msra.mxu1 %v134_v7 }
 0x1b9   :  { %v746_v43 = vmul.f32 1.442695, %v703_v6  ;;  %v718_v53 = vsub.f32 %v2240_v54, %v681_v10  ;;  %802 = vadd.xlane.f32.xlu0 %v2401_v8  ;;  %v2408_v13 = vpop.eup %1735  ;;  %1620 = vmatprep.subr.mxu0 %v115_v12 }
 0x1ba   :  { %v649_v14 = vpop.xlane.xlu0 %648  ;;  %1672 = vmatprep.subr.mxu1 %v133_v44  ;;  %1621 = vmatpush3.msra.mxu0 %v115_v12 }
 0x1bb   :  { %1749 = vpow2.f32 %v746_v43  ;;  %v702_v45 = vsub.f32 %v2243_v55, %v649_v14  ;;  %834 = vadd.xlane.f32.xlu1 %v2408_v13  ;;  %v776_v46 = vmul.f32 1.442695, %v718_v53  ;;  %v132_v55 = vld [vmem:[%s2660_s2 + $0x98] sm:$0xff]  ;;  %1673 = vmatpush3.msra.mxu1 %v133_v44 }
 0x1bc   :  { %v2415_v54 = vpop.eup %1737  ;;  %v687_v15 = vpop.xlane.xlu1 %686  ;;  %1751 = vpow2.f32 %v778_v42  ;;  %1622 = vmatprep.subr.mxu0 %v114_v17  ;;  %1674 = vmatprep.subr.mxu1 %v132_v55 }
 0x1bd   :  { %v744_v18 = vmul.f32 1.442695, %v702_v45  ;;  %v721_v20 = vsub.f32 %v2245_v56, %v687_v15  ;;  %800 = vadd.xlane.f32.xlu0 %v2415_v54  ;;  %v2425_v21 = vpop.eup %1739  ;;  %v113_v56 = vld [vmem:[%s2660_s2] sm:$0xff]  ;;  %1623 = vmatpush3.msra.mxu0 %v114_v17  ;;  %s1859_s2 = smov [#allocation2]  }
 0x1be   :  { %v655_v22 = vpop.xlane.xlu0 %654  ;;  %1675 = vmatpush3.msra.mxu1 %v132_v55  ;;  %1624 = vmatprep.subr.mxu0 %v113_v56  ;;  %s1277_s17 = sshll.u32 %s1859_s2, 4  ;;  %s1278_s17 = int_to_ptr.vmem [resolvable:$true] %s1277_s17 }
 0x1bf   :  { %1753 = vpow2.f32 %v744_v18  ;;  %v705_v23 = vsub.f32 %v2248_v57, %v655_v22  ;;  %832 = vadd.xlane.f32.xlu1 %v2425_v21  ;;  %v782_v27 = vmul.f32 1.442695, %v721_v20  ;;  %1676 = vmatprep.subr.mxu1 %v131_v25  ;;  %s1837_s18 = scalar_lea.vmem %s1278_s17, 4096  ;;  %p1842_p1 = scmp.lt.s32.totalorder %s1278_s17, %s1278_s17 }
 0x1c0   :  { %v2435_v47 = vpop.eup %1741  ;;  %v685_v26 = vpop.xlane.xlu1 %684  ;;  %1755 = vpow2.f32 %v776_v46  ;;  %1625 = vmatpush3.msra.mxu0 %v113_v56  ;;  %1677 = vmatpush3.msra.mxu1 %v131_v25  ;;  %p1838_p0 = scmp.ne.s32.totalorder %s1278_s17, %s1837_s18  ;;  %p1843_p2 = scmp.lt.s32.totalorder %s1837_s18, %s1837_s18 }
 0x1c1   :  { %v750_v48 = vmul.f32 1.442695, %v705_v23  ;;  %v720_v57 = vsub.f32 %v2250_v58, %v685_v26  ;;  %806 = vadd.xlane.f32.xlu0 %v2435_v47  ;;  %v2439_v28 = vpop.eup %1743  ;;  %1678 = vmatprep.subr.mxu1 %v130_v31 }
 0x1c2   :  { %v653_v30 = vpop.xlane.xlu0 %652  ;;  %1679 = vmatpush3.msra.mxu1 %v130_v31  ;;  %p1844_p3 = por %p1843_p2, %p1842_p1 }
 0x1c3   :  { %1757 = vpow2.f32 %v750_v48  ;;  %v704_v32 = vsub.f32 %v2254_v59, %v653_v30  ;;  %838 = vadd.xlane.f32.xlu1 %v2439_v28  ;;  %v780_v35 = vmul.f32 1.442695, %v720_v57  ;;  %1680 = vmatprep.subr.mxu1 %v129_v33 }
 0x1c4   :  { %v2446_v49 = vpop.eup %1745  ;;  %v689_v58 = vpop.xlane.xlu1 %688  ;;  %1759 = vpow2.f32 %v782_v27  ;;  %1681 = vmatpush3.msra.mxu1 %v129_v33  ;;  %p1845_p4 = pnand %p1844_p3, %p1838_p0 }
 0x1c5   :  { %v748_v0 = vmul.f32 1.442695, %v704_v32  ;;  %v722_v37 = vsub.f32 %v2262_v62, %v689_v58  ;;  %804 = vadd.xlane.f32.xlu0 %v2446_v49  ;;  %v2453_v59 = vpop.eup %1747 }
 0x1c6   :  { %v657_v1 = vpop.xlane.xlu0 %656 }
 0x1c7   :  { %1761 = vpow2.f32 %v748_v0  ;;  %v706_v2 = vsub.f32 %v2265_v63, %v657_v1  ;;  %836 = vadd.xlane.f32.xlu1 %v2453_v59  ;;  %v784_v5 = vmul.f32 1.442695, %v722_v37 }
 0x1c8   :  { %v2457_v39 = vpop.eup %1749  ;;  %v691_v3 = vpop.xlane.xlu1 %690  ;;  %1763 = vpow2.f32 %v780_v35 }
 0x1c9   :  { %v752_v62 = vmul.f32 1.442695, %v706_v2  ;;  %v723_v51 = vsub.f32 %v2256_v60, %v691_v3  ;;  %810 = vadd.xlane.f32.xlu0 %v2457_v39  ;;  %v2461_v41 = vpop.eup %1751 }
 0x1ca   :  { %v659_v6 = vpop.xlane.xlu0 %658 }
 0x1cb   :  { %1765 = vpow2.f32 %v752_v62  ;;  %v707_v63 = vsub.f32 %v2259_v61, %v659_v6  ;;  %842 = vadd.xlane.f32.xlu1 %v2461_v41  ;;  %v786_v7 = vmul.f32 1.442695, %v723_v51 }
 0x1cc   :  { %v2465_v52 = vpop.eup %1753  ;;  %1767 = vpow2.f32 %v784_v5 }
 0x1cd   :  { %v754_v10 = vmul.f32 1.442695, %v707_v63  ;;  %808 = vadd.xlane.f32.xlu0 %v2465_v52  ;;  %v2468_v42 = vpop.eup %1755 }
 0x1cf   :  { %1769 = vpow2.f32 %v754_v10  ;;  %840 = vadd.xlane.f32.xlu1 %v2468_v42 }
 0x1d0   :  { %v2471_v60 = vpop.eup %1757  ;;  %1771 = vpow2.f32 %v786_v7 }
 0x1d1   :  { %814 = vadd.xlane.f32.xlu0 %v2471_v60  ;;  %v2474_v61 = vpop.eup %1759 }
 0x1d3   :  { %846 = vadd.xlane.f32.xlu1 %v2474_v61 }
 0x1d4   :  { %v2477_v43 = vpop.eup %1761 }
 0x1d5   :  { %812 = vadd.xlane.f32.xlu0 %v2477_v43  ;;  %v2480_v53 = vpop.eup %1763 }
 0x1d7   :  { %844 = vadd.xlane.f32.xlu1 %v2480_v53 }
 0x1d8   :  { %v2483_v12 = vpop.eup %1765 }
 0x1d9   :  { %816 = vadd.xlane.f32.xlu0 %v2483_v12  ;;  %v2486_v14 = vpop.eup %1767 }
 0x1db   :  { %848 = vadd.xlane.f32.xlu1 %v2486_v14 }
 0x1dc   :  { %v2489_v44 = vpop.eup %1769 }
 0x1dd   :  { %818 = vadd.xlane.f32.xlu0 %v2489_v44  ;;  %v2492_v45 = vpop.eup %1771 }
 0x1df   :  { %850 = vadd.xlane.f32.xlu1 %v2492_v45 }
 0x228   :  { %v791_v15 = vpop.xlane.xlu0 %790 }
 0x229   :  { %1773 = vrcp.f32 %v791_v15 }
 0x22c   :  { %v823_v17 = vpop.xlane.xlu1 %822  ;;  %v789_v46 = vpop.xlane.xlu0 %788 }
 0x22d   :  { %1775 = vrcp.f32 %v823_v17 }
 0x22e   :  { %1777 = vrcp.f32 %v789_v46 }
 0x230   :  { %v821_v18 = vpop.xlane.xlu1 %820 }
 0x231   :  { %1779 = vrcp.f32 %v821_v18 }
 0x232   :  { %v795_v20 = vpop.xlane.xlu0 %794 }
 0x233   :  { %1781 = vrcp.f32 %v795_v20 }
 0x234   :  { %v827_v55 = vpop.xlane.xlu1 %826 }
 0x235   :  { %1783 = vrcp.f32 %v827_v55 }
 0x236   :  { %v1774_v22 = vpop.eup %1773  ;;  %v793_v23 = vpop.xlane.xlu0 %792 }
 0x237   :  { %1785 = vrcp.f32 %v793_v23  ;;  %v885_v56 = vmul.f32 %v1774_v22, %v2310_v36 }
 0x238   :  { %v825_v25 = vpop.xlane.xlu1 %824 }
 0x239   :  { %1787 = vrcp.f32 %v825_v25  ;;  %1207 = vst [vmem:[#allocation2 + $0x8] sm:$0xff] %v885_v56 }
 0x23a   :  { %v1776_v26 = vpop.eup %1775  ;;  %v799_v27 = vpop.xlane.xlu0 %798 }
 0x23b   :  { %v1778_v48 = vpop.eup %1777  ;;  %1789 = vrcp.f32 %v799_v27  ;;  %v901_v57 = vmul.f32 %v1776_v26, %v2317_v4 }
 0x23c   :  { %v831_v30 = vpop.xlane.xlu1 %830  ;;  %v884_v31 = vmul.f32 %v1778_v48, %v2314_v38 }
 0x23d   :  { %1791 = vrcp.f32 %v831_v30  ;;  %1223 = vst [vmem:[#allocation2 + $0x88] sm:$0xff] %v901_v57 }
 0x23e   :  { %v1780_v32 = vpop.eup %1779  ;;  %1626 = vmatprep.mubr.f32.mxu0 %v884_v31  ;;  %1206 = vst [vmem:[#allocation2] sm:$0xff] %v884_v31  ;;  %v797_v58 = vpop.xlane.xlu0 %796 }
 0x23f   :  { %1627 = vmatmul.mubr.f32.vlgmr.msra.gmra.mxu0 %v885_v56  ;;  %1793 = vrcp.f32 %v797_v58  ;;  %v900_v36 = vmul.f32 %v1780_v32, %v2323_v9 }
 0x240   :  { %v1782_v33 = vpop.eup %1781  ;;  %v829_v35 = vpop.xlane.xlu1 %828 }
 0x241   :  { %1795 = vrcp.f32 %v829_v35  ;;  %1682 = vmatprep.mubr.f32.mxu1 %v900_v36  ;;  %1222 = vst [vmem:[#allocation2 + $0x80] sm:$0xff] %v900_v36  ;;  %v887_v4 = vmul.f32 %v1782_v33, %v2327_v11 }
 0x242   :  { %v1784_v0 = vpop.eup %1783  ;;  %1683 = vmatmul.mubr.f32.vlgmr.msra.gmra.mxu1 %v901_v57  ;;  %v803_v38 = vpop.xlane.xlu0 %802 }
 0x243   :  { %1797 = vrcp.f32 %v803_v38  ;;  %1209 = vst [vmem:[#allocation2 + $0x18] sm:$0xff] %v887_v4  ;;  %v903_v37 = vmul.f32 %v1784_v0, %v2340_v16 }
 0x244   :  { %v1786_v1 = vpop.eup %1785  ;;  %v835_v2 = vpop.xlane.xlu1 %834 }
 0x245   :  { %1799 = vrcp.f32 %v835_v2  ;;  %v886_v3 = vmul.f32 %v1786_v1, %v2347_v19  ;;  %1225 = vst [vmem:[#allocation2 + $0x98] sm:$0xff] %v903_v37 }
 0x246   :  { %v1788_v9 = vpop.eup %1787  ;;  %v801_v5 = vpop.xlane.xlu0 %800 }
 0x247   :  { %1801 = vrcp.f32 %v801_v5  ;;  %1629 = vmatprep.mubr.f32.mxu0 %v886_v3  ;;  %1208 = vst [vmem:[#allocation2 + $0x10] sm:$0xff] %v886_v3  ;;  %v902_v11 = vmul.f32 %v1788_v9, %v2351_v24 }
 0x248   :  { %v1790_v62 = vpop.eup %1789  ;;  %v833_v51 = vpop.xlane.xlu1 %832  ;;  %1630 = vmatmul.mubr.f32.gmra.mxu0 %v887_v4 }
 0x249   :  { %1803 = vrcp.f32 %v833_v51  ;;  %1685 = vmatprep.mubr.f32.mxu1 %v902_v11  ;;  %1224 = vst [vmem:[#allocation2 + $0x90] sm:$0xff] %v902_v11  ;;  %v889_v16 = vmul.f32 %v1790_v62, %v2367_v29 }
 0x24a   :  { %v1792_v6 = vpop.eup %1791  ;;  %1686 = vmatmul.mubr.f32.gmra.mxu1 %v903_v37  ;;  %v807_v63 = vpop.xlane.xlu0 %806 }
 0x24b   :  { %1805 = vrcp.f32 %v807_v63  ;;  %1211 = vst [vmem:[#allocation2 + $0x28] sm:$0xff] %v889_v16  ;;  %v905_v19 = vmul.f32 %v1792_v6, %v2374_v34 }
 0x24c   :  { %v1794_v7 = vpop.eup %1793  ;;  %v839_v10 = vpop.xlane.xlu1 %838 }
 0x24d   :  { %1807 = vrcp.f32 %v839_v10  ;;  %v888_v24 = vmul.f32 %v1794_v7, %v2381_v50  ;;  %1227 = vst [vmem:[#allocation2 + $0xa8] sm:$0xff] %v905_v19 }
 0x24e   :  { %v1796_v15 = vpop.eup %1795  ;;  %v805_v17 = vpop.xlane.xlu0 %804 }
 0x24f   :  { %1809 = vrcp.f32 %v805_v17  ;;  %1632 = vmatprep.mubr.f32.mxu0 %v888_v24  ;;  %1210 = vst [vmem:[#allocation2 + $0x20] sm:$0xff] %v888_v24  ;;  %v904_v29 = vmul.f32 %v1796_v15, %v2391_v40 }
 0x250   :  { %v1798_v46 = vpop.eup %1797  ;;  %v837_v18 = vpop.xlane.xlu1 %836  ;;  %1633 = vmatmul.mubr.f32.gmra.mxu0 %v889_v16 }
 0x251   :  { %1811 = vrcp.f32 %v837_v18  ;;  %1688 = vmatprep.mubr.f32.mxu1 %v904_v29  ;;  %1226 = vst [vmem:[#allocation2 + $0xa0] sm:$0xff] %v904_v29  ;;  %v891_v34 = vmul.f32 %v1798_v46, %v2401_v8 }
 0x252   :  { %v1800_v20 = vpop.eup %1799  ;;  %1689 = vmatmul.mubr.f32.gmra.mxu1 %v905_v19  ;;  %v811_v55 = vpop.xlane.xlu0 %810 }
 0x253   :  { %1813 = vrcp.f32 %v811_v55  ;;  %1213 = vst [vmem:[#allocation2 + $0x38] sm:$0xff] %v891_v34  ;;  %v907_v50 = vmul.f32 %v1800_v20, %v2408_v13 }
 0x254   :  { %v1802_v22 = vpop.eup %1801  ;;  %v843_v23 = vpop.xlane.xlu1 %842 }
 0x255   :  { %1815 = vrcp.f32 %v843_v23  ;;  %v890_v40 = vmul.f32 %v1802_v22, %v2415_v54  ;;  %1229 = vst [vmem:[#allocation2 + $0xb8] sm:$0xff] %v907_v50 }
 0x256   :  { %v1804_v56 = vpop.eup %1803  ;;  %v809_v25 = vpop.xlane.xlu0 %808 }
 0x257   :  { %1817 = vrcp.f32 %v809_v25  ;;  %1635 = vmatprep.mubr.f32.mxu0 %v890_v40  ;;  %1212 = vst [vmem:[#allocation2 + $0x30] sm:$0xff] %v890_v40  ;;  %v906_v8 = vmul.f32 %v1804_v56, %v2425_v21 }
 0x258   :  { %v1806_v26 = vpop.eup %1805  ;;  %v841_v27 = vpop.xlane.xlu1 %840  ;;  %1636 = vmatmul.mubr.f32.gmra.mxu0 %v891_v34 }
 0x259   :  { %1819 = vrcp.f32 %v841_v27  ;;  %1691 = vmatprep.mubr.f32.mxu1 %v906_v8  ;;  %1228 = vst [vmem:[#allocation2 + $0xb0] sm:$0xff] %v906_v8  ;;  %v893_v13 = vmul.f32 %v1806_v26, %v2435_v47 }
 0x25a   :  { %v1808_v48 = vpop.eup %1807  ;;  %1692 = vmatmul.mubr.f32.gmra.mxu1 %v907_v50  ;;  %v815_v57 = vpop.xlane.xlu0 %814 }
 0x25b   :  { %1821 = vrcp.f32 %v815_v57  ;;  %1215 = vst [vmem:[#allocation2 + $0x48] sm:$0xff] %v893_v13  ;;  %v909_v54 = vmul.f32 %v1808_v48, %v2439_v28 }
 0x25c   :  { %v1810_v30 = vpop.eup %1809  ;;  %v847_v31 = vpop.xlane.xlu1 %846 }
 0x25d   :  { %1823 = vrcp.f32 %v847_v31  ;;  %v892_v21 = vmul.f32 %v1810_v30, %v2446_v49  ;;  %1231 = vst [vmem:[#allocation2 + $0xc8] sm:$0xff] %v909_v54 }
 0x25e   :  { %v1812_v32 = vpop.eup %1811  ;;  %v813_v58 = vpop.xlane.xlu0 %812 }
 0x25f   :  { %1825 = vrcp.f32 %v813_v58  ;;  %1638 = vmatprep.mubr.f32.mxu0 %v892_v21  ;;  %1214 = vst [vmem:[#allocation2 + $0x40] sm:$0xff] %v892_v21  ;;  %v908_v47 = vmul.f32 %v1812_v32, %v2453_v59 }
 0x260   :  { %v1814_v36 = vpop.eup %1813  ;;  %v845_v33 = vpop.xlane.xlu1 %844  ;;  %1639 = vmatmul.mubr.f32.gmra.mxu0 %v893_v13 }
 0x261   :  { %1827 = vrcp.f32 %v845_v33  ;;  %1694 = vmatprep.mubr.f32.mxu1 %v908_v47  ;;  %1230 = vst [vmem:[#allocation2 + $0xc0] sm:$0xff] %v908_v47  ;;  %v895_v28 = vmul.f32 %v1814_v36, %v2457_v39 }
 0x262   :  { %v1816_v35 = vpop.eup %1815  ;;  %1695 = vmatmul.mubr.f32.gmra.mxu1 %v909_v54  ;;  %v817_v4 = vpop.xlane.xlu0 %816 }
 0x263   :  { %1829 = vrcp.f32 %v817_v4  ;;  %1217 = vst [vmem:[#allocation2 + $0x58] sm:$0xff] %v895_v28  ;;  %v911_v49 = vmul.f32 %v1816_v35, %v2461_v41 }
 0x264   :  { %v1818_v0 = vpop.eup %1817  ;;  %v849_v38 = vpop.xlane.xlu1 %848 }
 0x265   :  { %1831 = vrcp.f32 %v849_v38  ;;  %v894_v59 = vmul.f32 %v1818_v0, %v2465_v52  ;;  %1233 = vst [vmem:[#allocation2 + $0xd8] sm:$0xff] %v911_v49 }
 0x266   :  { %v1820_v37 = vpop.eup %1819  ;;  %v819_v1 = vpop.xlane.xlu0 %818 }
 0x267   :  { %1833 = vrcp.f32 %v819_v1  ;;  %1641 = vmatprep.mubr.f32.mxu0 %v894_v59  ;;  %1216 = vst [vmem:[#allocation2 + $0x50] sm:$0xff] %v894_v59  ;;  %v910_v39 = vmul.f32 %v1820_v37, %v2468_v42 }
 0x268   :  { %v1822_v2 = vpop.eup %1821  ;;  %v851_v3 = vpop.xlane.xlu1 %850  ;;  %1642 = vmatmul.mubr.f32.gmra.mxu0 %v895_v28 }
 0x269   :  { %1835 = vrcp.f32 %v851_v3  ;;  %1697 = vmatprep.mubr.f32.mxu1 %v910_v39  ;;  %1232 = vst [vmem:[#allocation2 + $0xd0] sm:$0xff] %v910_v39  ;;  %v897_v41 = vmul.f32 %v1822_v2, %v2471_v60 }
 0x26a   :  { %v1824_v9 = vpop.eup %1823  ;;  %1698 = vmatmul.mubr.f32.gmra.mxu1 %v911_v49 }
 0x26b   :  { %1219 = vst [vmem:[#allocation2 + $0x68] sm:$0xff] %v897_v41  ;;  %v913_v52 = vmul.f32 %v1824_v9, %v2474_v61 }
 0x26c   :  { %v1826_v5 = vpop.eup %1825 }
 0x26d   :  { %v896_v11 = vmul.f32 %v1826_v5, %v2477_v43  ;;  %1235 = vst [vmem:[#allocation2 + $0xe8] sm:$0xff] %v913_v52 }
 0x26e   :  { %v1828_v62 = vpop.eup %1827 }
 0x26f   :  { %1644 = vmatprep.mubr.f32.mxu0 %v896_v11  ;;  %1218 = vst [vmem:[#allocation2 + $0x60] sm:$0xff] %v896_v11  ;;  %v912_v42 = vmul.f32 %v1828_v62, %v2480_v53 }
 0x270   :  { %v1830_v51 = vpop.eup %1829  ;;  %1645 = vmatmul.mubr.f32.gmra.mxu0 %v897_v41 }
 0x271   :  { %1700 = vmatprep.mubr.f32.mxu1 %v912_v42  ;;  %1234 = vst [vmem:[#allocation2 + $0xe0] sm:$0xff] %v912_v42  ;;  %v898_v60 = vmul.f32 %v1830_v51, %v2483_v12 }
 0x272   :  { %v1832_v16 = vpop.eup %1831  ;;  %1701 = vmatmul.mubr.f32.gmra.mxu1 %v913_v52 }
 0x273   :  { %1647 = vmatprep.mubr.f32.mxu0 %v898_v60  ;;  %1220 = vst [vmem:[#allocation2 + $0x70] sm:$0xff] %v898_v60  ;;  %v914_v61 = vmul.f32 %v1832_v16, %v2486_v14 }
 0x274   :  { %v1834_v6 = vpop.eup %1833 }
 0x275   :  { %1703 = vmatprep.mubr.f32.mxu1 %v914_v61  ;;  %1236 = vst [vmem:[#allocation2 + $0xf0] sm:$0xff] %v914_v61  ;;  %v899_v43 = vmul.f32 %v1834_v6, %v2489_v44 }
 0x276   :  { %v1836_v63 = vpop.eup %1835 }
 0x277   :  { %1648 = vmatmul.mubr.f32.gmra.mxu0 %v899_v43  ;;  %1221 = vst [vmem:[#allocation2 + $0x78] sm:$0xff] %v899_v43  ;;  %v915_v53 = vmul.f32 %v1836_v63, %v2492_v45 }
 0x279   :  { %1704 = vmatmul.mubr.f32.gmra.mxu1 %v915_v53  ;;  %1237 = vst [vmem:[#allocation2 + $0xf8] sm:$0xff] %v915_v53 }
 0x27a   :  { %1848 = shalt.err (!%p1845_p4)
}
 0x27b   :  { %s1860_s19 = smov 128   ;;  %s1861_s20 = smov 8  }
 0x27c   :  { %1283 = dma.vmem_to_hbm [thread:$0]  %s1278_s17, 4096, %s2662_s4, [#allocation3], %s1860_s19, %s1860_s19, %s1861_s20  }
 0x2ff   :  { %v1628_v12 = vpop.f32.mrf.mxu0 }
 0x300   :  { %1239 = vst.msk [vmem:[%s2661_s3 + $0x8] sm:$0xff] %vm145_vm0, %v1628_v12 }
 0x301   :  { %v982_v14 = vpop.f32.mrf.mxu0 }
 0x302   :  { %1238 = vst.msk [vmem:[%s2661_s3] sm:$0xff] %vm145_vm0, %v982_v14  ;;  %v1684_v44 = vpop.f32.mrf.mxu1 }
 0x303   :  { %1255 = vst.msk [vmem:[%s2661_s3 + $0x88] sm:$0xff] %vm145_vm0, %v1684_v44 }
 0x304   :  { %v1127_v45 = vpop.f32.mrf.mxu1 }
 0x305   :  { %1254 = vst.msk [vmem:[%s2661_s3 + $0x80] sm:$0xff] %vm145_vm0, %v1127_v45 }
 0x308   :  { %v1631_v19 = vpop.f32.mrf.mxu0 }
 0x309   :  { %1241 = vst.msk [vmem:[%s2661_s3 + $0x18] sm:$0xff] %vm145_vm0, %v1631_v19 }
 0x30a   :  { %v992_v7 = vpop.f32.mrf.mxu0  ;;  %v1687_v10 = vpop.f32.mrf.mxu1 }
 0x30b   :  { %1240 = vst.msk [vmem:[%s2661_s3 + $0x10] sm:$0xff] %vm145_vm0, %v992_v7  ;;  %1257 = vst.msk [vmem:[%s2661_s3 + $0x98] sm:$0xff] %vm145_vm0, %v1687_v10 }
 0x30c   :  { %v1137_v24 = vpop.f32.mrf.mxu1 }
 0x30d   :  { %1256 = vst.msk [vmem:[%s2661_s3 + $0x90] sm:$0xff] %vm145_vm0, %v1137_v24 }
 0x310   :  { %v1634_v15 = vpop.f32.mrf.mxu0 }
 0x311   :  { %1243 = vst.msk [vmem:[%s2661_s3 + $0x28] sm:$0xff] %vm145_vm0, %v1634_v15 }
 0x312   :  { %v1002_v17 = vpop.f32.mrf.mxu0  ;;  %v1690_v29 = vpop.f32.mrf.mxu1 }
 0x313   :  { %1242 = vst.msk [vmem:[%s2661_s3 + $0x20] sm:$0xff] %vm145_vm0, %v1002_v17  ;;  %1259 = vst.msk [vmem:[%s2661_s3 + $0xa8] sm:$0xff] %vm145_vm0, %v1690_v29 }
 0x314   :  { %v1147_v46 = vpop.f32.mrf.mxu1 }
 0x315   :  { %1258 = vst.msk [vmem:[%s2661_s3 + $0xa0] sm:$0xff] %vm145_vm0, %v1147_v46 }
 0x318   :  { %v1637_v18 = vpop.f32.mrf.mxu0 }
 0x319   :  { %1245 = vst.msk [vmem:[%s2661_s3 + $0x38] sm:$0xff] %vm145_vm0, %v1637_v18 }
 0x31a   :  { %v1012_v34 = vpop.f32.mrf.mxu0  ;;  %v1693_v20 = vpop.f32.mrf.mxu1 }
 0x31b   :  { %1244 = vst.msk [vmem:[%s2661_s3 + $0x30] sm:$0xff] %vm145_vm0, %v1012_v34  ;;  %1261 = vst.msk [vmem:[%s2661_s3 + $0xb8] sm:$0xff] %vm145_vm0, %v1693_v20 }
 0x31c   :  { %v1157_v55 = vpop.f32.mrf.mxu1 }
 0x31d   :  { %1260 = vst.msk [vmem:[%s2661_s3 + $0xb0] sm:$0xff] %vm145_vm0, %v1157_v55 }
 0x320   :  { %v1640_v50 = vpop.f32.mrf.mxu0 }
 0x321   :  { %1247 = vst.msk [vmem:[%s2661_s3 + $0x48] sm:$0xff] %vm145_vm0, %v1640_v50 }
 0x322   :  { %v1022_v22 = vpop.f32.mrf.mxu0  ;;  %v1696_v23 = vpop.f32.mrf.mxu1 }
 0x323   :  { %1246 = vst.msk [vmem:[%s2661_s3 + $0x40] sm:$0xff] %vm145_vm0, %v1022_v22  ;;  %1263 = vst.msk [vmem:[%s2661_s3 + $0xc8] sm:$0xff] %vm145_vm0, %v1696_v23 }
 0x324   :  { %v1167_v40 = vpop.f32.mrf.mxu1 }
 0x325   :  { %1262 = vst.msk [vmem:[%s2661_s3 + $0xc0] sm:$0xff] %vm145_vm0, %v1167_v40 }
 0x328   :  { %v1643_v56 = vpop.f32.mrf.mxu0 }
 0x329   :  { %1249 = vst.msk [vmem:[%s2661_s3 + $0x58] sm:$0xff] %vm145_vm0, %v1643_v56 }
 0x32a   :  { %v1032_v25 = vpop.f32.mrf.mxu0  ;;  %v1699_v8 = vpop.f32.mrf.mxu1 }
 0x32b   :  { %1248 = vst.msk [vmem:[%s2661_s3 + $0x50] sm:$0xff] %vm145_vm0, %v1032_v25  ;;  %1265 = vst.msk [vmem:[%s2661_s3 + $0xd8] sm:$0xff] %vm145_vm0, %v1699_v8 }
 0x32c   :  { %v1177_v26 = vpop.f32.mrf.mxu1 }
 0x32d   :  { %1264 = vst.msk [vmem:[%s2661_s3 + $0xd0] sm:$0xff] %vm145_vm0, %v1177_v26 }
 0x330   :  { %v1646_v27 = vpop.f32.mrf.mxu0 }
 0x331   :  { %1251 = vst.msk [vmem:[%s2661_s3 + $0x68] sm:$0xff] %vm145_vm0, %v1646_v27 }
 0x332   :  { %v1042_v13 = vpop.f32.mrf.mxu0  ;;  %v1702_v48 = vpop.f32.mrf.mxu1 }
 0x333   :  { %1250 = vst.msk [vmem:[%s2661_s3 + $0x60] sm:$0xff] %vm145_vm0, %v1042_v13  ;;  %1267 = vst.msk [vmem:[%s2661_s3 + $0xe8] sm:$0xff] %vm145_vm0, %v1702_v48 }
 0x334   :  { %v1187_v57 = vpop.f32.mrf.mxu1 }
 0x335   :  { %1266 = vst.msk [vmem:[%s2661_s3 + $0xe0] sm:$0xff] %vm145_vm0, %v1187_v57 }
 0x337   :  { %v1649_v54 = vpop.f32.mrf.mxu0 }
 0x338   :  { %1253 = vst.msk [vmem:[%s2661_s3 + $0x78] sm:$0xff] %vm145_vm0, %v1649_v54 }
 0x339   :  { %v1052_v30 = vpop.f32.mrf.mxu0  ;;  %v1705_v31 = vpop.f32.mrf.mxu1 }
 0x33a   :  { %1252 = vst.msk [vmem:[%s2661_s3 + $0x70] sm:$0xff] %vm145_vm0, %v1052_v30  ;;  %1269 = vst.msk [vmem:[%s2661_s3 + $0xf8] sm:$0xff] %vm145_vm0, %v1705_v31 }
 0x33b   :  { %v1197_v21 = vpop.f32.mrf.mxu1 }
 0x33c   :  { %1268 = vst.msk [vmem:[%s2661_s3 + $0xf0] sm:$0xff] %vm145_vm0, %v1197_v21 }
 0x33d   :  { %1857 = dma.done.wait [#allocation3], 4096  }
 0x33e   :  { %1858 = vsyncadd [#allocation3], 4294963200 }
 0x33f   :  { %1289 = vsyncpa [#allocation3], 1 }

</bundles_post_ra>
